<compile_context>
chip_gen: v5e
topology: v5e:2x2
jax: 0.10.0
libtpu: 0.0.40
codegen_flags: <defaults>
</compile_context>

<pallas_src>
import jax
import jax.numpy as jnp
from jax.experimental import pallas as pl
from jax.experimental.pallas import tpu as pltpu

_MiB = 1024 * 1024


# ----------------------------------------------------------------------------------------
# One-time hardware probe (module level — NOT a per-call try/except kernel switch).
# ----------------------------------------------------------------------------------------
def _probe_vmem_capacity_bytes():
    try:
        cap = int(pltpu.get_tpu_info().vmem_capacity_bytes)
        if cap > 0:
            return cap
    except Exception:
        pass
    return 64 * _MiB  # conservative per-core fallback (v7x)


_VMEM_CAP = _probe_vmem_capacity_bytes()


# ----------------------------------------------------------------------------------------
# 1) AxialClsModel3 head: AttentionPooling + fc, fused (online softmax over position tiles).
# ----------------------------------------------------------------------------------------
def _attn_head_kernel(f_ref, wa_ref, ba_ref, wfct_ref, bf_ref, o_ref,
                      m_sc, l_sc, acc_sc):
    n = pl.program_id(1)

    @pl.when(n == 0)
    def _():
        m_sc[...] = jnp.full(m_sc.shape, -jnp.inf, dtype=m_sc.dtype)
        l_sc[...] = jnp.zeros(l_sc.shape, dtype=l_sc.dtype)
        acc_sc[...] = jnp.zeros(acc_sc.shape, dtype=acc_sc.dtype)

    # Native-dtype load, f32 cast in-kernel (feedback: no host-side astype copy).
    f = f_ref[...].astype(jnp.float32)                               # (Bt, C, Nt)

    # AttentionPooling.attention_weights: Linear(C, 1) -> scores over positions.
    s = jnp.sum(wa_ref[...][None, :, :] * f, axis=1, keepdims=True) + ba_ref[...]  # (Bt,1,Nt)

    # Online-softmax accumulation across position tiles (flash-style).
    m_prev = m_sc[...]                                               # (Bt, 1, 1)
    m_new = jnp.maximum(m_prev, jnp.max(s, axis=2, keepdims=True))   # (Bt, 1, 1)
    alpha = jnp.exp(m_prev - m_new)                                  # (Bt, 1, 1)
    e = jnp.exp(s - m_new)                                           # (Bt, 1, Nt)
    l_sc[...] = alpha * l_sc[...] + jnp.sum(e, axis=2, keepdims=True)
    acc_sc[...] = alpha * acc_sc[...] + jnp.sum(f * e, axis=2, keepdims=True)  # (Bt, C, 1)
    m_sc[...] = m_new

    @pl.when(n == pl.num_programs(1) - 1)
    def _():
        # Normalize once at the end with an approximate reciprocal (EUP slot).
        inv_l = pl.reciprocal(l_sc[...], approx=True)                # (Bt, 1, 1)
        pooled = acc_sc[...] * inv_l                                 # (Bt, C, 1)
        # fc head: Dropout is identity at inference; Linear(C, K).
        logits = (jnp.sum(pooled * wfct_ref[...][None, :, :], axis=1, keepdims=True)
                  + bf_ref[...][None, :, :])                         # (Bt, 1, K)
        o_ref[...] = logits.astype(o_ref.dtype)


def _choose_head_tiles(B, C, N, itemsize, lane_tile=None, batch_tile=None):
    """Pick (Bt, Nt). Block budget derived from the probed VMEM capacity so the same
    code is safe on v5e/v6e (128 MiB) and v7x (64 MiB)."""
    budget = max(512 * 1024, min(_VMEM_CAP // 32, 4 * _MiB))

    if lane_tile is not None:
        nt = int(lane_tile)
        assert N % nt == 0 and (nt == N or nt % 128 == 0), "invalid lane_tile"
    elif N % 128 == 0:
        nt = 128
        for t in range(256, N + 1, 128):
            if N % t == 0 and C * t * itemsize <= budget:
                nt = t
    else:
        nt = N  # full-extent lane block is always legal

    if batch_tile is not None:
        bt = int(batch_tile)
        assert B % bt == 0, "invalid batch_tile"
    else:
        # Batch several elements per step, but keep >= 2 batch-parallel grid steps when
        # B >= 2 so both v7x TensorCores get work.
        bt_cap = min(8, max(1, B // 2))
        bt = 1
        for cand in range(2, bt_cap + 1):
            if B % cand == 0 and cand * C * nt * itemsize <= budget:
                bt = cand
    return bt, nt


def attention_pool_fc(feats, attn_w, attn_b, fc_w, fc_b, *, lane_tile=None, batch_tile=None):
    """AxialClsModel3 head: flatten(2,4) -> permute(0,2,1) -> AttentionPooling
    -> Dropout (identity at inference) -> Linear(C, K).

    feats  : (B, C, *spatial) backbone features, kept in their NATIVE dtype (e.g. bf16).
    attn_w : PyTorch nn.Linear(C, 1).weight, shape (1, C) (a flat (C,) is also accepted).
    attn_b : nn.Linear(C, 1).bias, shape (1,) or scalar.
    fc_w   : nn.Linear(C, K).weight, shape (K, C).
    fc_b   : nn.Linear(C, K).bias, shape (K,).
    """
    B, C = int(feats.shape[0]), int(feats.shape[1])
    N = 1
    for d in feats.shape[2:]:
        N *= int(d)
    K = int(fc_w.shape[0])

    f = feats.reshape(B, C, N)                        # no dtype cast here (feedback #1)

    # Explicit PyTorch weight-layout handling (review correctness concern):
    # nn.Linear(C, 1).weight is (1, C) -> transpose to a (C, 1) column.
    attn_w = jnp.asarray(attn_w, jnp.float32)
    if attn_w.ndim == 2:
        wa_col = attn_w.reshape(1, C).T               # (C, 1)
    else:
        wa_col = attn_w.reshape(C, 1)
    ba2 = jnp.asarray(attn_b, jnp.float32).reshape(1, 1)
    wfc_t = jnp.asarray(fc_w, jnp.float32).reshape(K, C).T            # (C, K)
    bf2 = jnp.asarray(fc_b, jnp.float32).reshape(1, K)

    bt, nt = _choose_head_tiles(B, C, N, f.dtype.itemsize, lane_tile, batch_tile)
    n_b, n_n = B // bt, N // nt

    cost = pl.CostEstimate(
        flops=4 * B * C * N + 2 * B * C * K,
        transcendentals=B * N,
        bytes_accessed=(f.size * f.dtype.itemsize
                        + (C + 1 + C * K + K) * 4
                        + B * K * 4))

    out = pl.pallas_call(
        _attn_head_kernel,
        out_shape=jax.ShapeDtypeStruct((B, 1, K), jnp.float32),
        grid=(n_b, n_n),
        in_specs=[
            pl.BlockSpec((bt, C, nt), lambda b, n: (b, 0, n)),
            pl.BlockSpec((C, 1), lambda b, n: (0, 0)),
            pl.BlockSpec((1, 1), lambda b, n: (0, 0)),
            pl.BlockSpec((C, K), lambda b, n: (0, 0)),
            pl.BlockSpec((1, K), lambda b, n: (0, 0)),
        ],
        out_specs=pl.BlockSpec((bt, 1, K), lambda b, n: (b, 0, 0)),
        scratch_shapes=[
            pltpu.VMEM((bt, 1, 1), jnp.float32),      # running max
            pltpu.VMEM((bt, 1, 1), jnp.float32),      # running denom
            pltpu.VMEM((bt, C, 1), jnp.float32),      # running un-normalized pooled
        ],
        compiler_params=pltpu.CompilerParams(
            dimension_semantics=("parallel", "arbitrary"),
            vmem_limit_bytes=int(min(_VMEM_CAP // 2, 64 * _MiB))),
        cost_estimate=cost,
    )(f, wa_col, ba2, wfc_t, bf2)
    return out.reshape(B, K)


def ref_attention_pool_fc(feats, attn_w, attn_b, fc_w, fc_b):
    """Pure-JAX reference (same math, no matmuls, exact f32)."""
    B, C = feats.shape[:2]
    K = int(fc_w.shape[0])
    f = feats.reshape(B, C, -1).astype(jnp.float32)                   # (B, C, N)
    wa = jnp.asarray(attn_w, jnp.float32).reshape(-1)                 # (C,)
    ba = jnp.asarray(attn_b, jnp.float32).reshape(())
    scores = jnp.sum(f * wa[None, :, None], axis=1) + ba              # (B, N)
    scores = scores - jnp.max(scores, axis=1, keepdims=True)
    e = jnp.exp(scores)
    w = e / jnp.sum(e, axis=1, keepdims=True)                         # (B, N)
    pooled = jnp.sum(f * w[:, None, :], axis=2)                       # (B, C)
    wt = jnp.asarray(fc_w, jnp.float32).reshape(K, C)
    logits = jnp.sum(pooled[:, :, None] * wt.T[None, :, :], axis=1)
    return logits + jnp.asarray(fc_b, jnp.float32).reshape(1, K)      # (B, K)


# ----------------------------------------------------------------------------------------
# 2) SlidingSlicer: out[b, d, i, h, w] = x[b, d + i - PAD, h, w], zero padded along depth.
# ----------------------------------------------------------------------------------------
SLICE_SIZE = 3
PAD = SLICE_SIZE // 2


def _slicer_kernel_dense(x_ref, o_ref):
    """x_ref: (1, D, HWt); o_ref: (1, D*S, HWt) dense interleaved, row d*S + i = x[d+i-PAD].

    Per-depth contiguous 3-row stores (replaces the previous stride-3 sublane stores,
    which lower to one masked vst per output row and bind the store slot on v5e/v7x)."""
    D = x_ref.shape[1]
    hwt = x_ref.shape[2]
    for d in range(D):                                   # static unroll; contiguous stores
        lo = d - PAD
        hi = d + PAD + 1
        src_lo = max(lo, 0)
        src_hi = min(hi, D)
        parts = []
        if src_lo > lo:                                  # zero rows below the volume
            parts.append(jnp.zeros((src_lo - lo, hwt), dtype=o_ref.dtype))
        parts.append(x_ref[0, pl.ds(src_lo, src_hi - src_lo), :])
        if hi > src_hi:                                  # zero rows above the volume
            parts.append(jnp.zeros((hi - src_hi, hwt), dtype=o_ref.dtype))
        val = parts[0] if len(parts) == 1 else jnp.concatenate(parts, axis=0)
        o_ref[0, pl.ds(d * SLICE_SIZE, SLICE_SIZE), :] = val


def _choose_hw_tile(B, D, HW, itemsize):
    """Largest multiple-of-128 divisor of HW keeping the output block under a cap derived
    from the probed VMEM capacity (~8 MiB on 128 MiB parts, ~4 MiB on v7x's 64 MiB)."""
    if HW % 128 != 0:
        return HW                                        # full-extent block is always legal
    out_block_cap = max(2 * _MiB, min(8 * _MiB, _VMEM_CAP // 16))
    max_lanes = max(128, (out_block_cap // (SLICE_SIZE * D * itemsize)) // 128 * 128)
    best = 128
    for t in range(256, HW + 1, 128):
        if t > max_lanes:
            break
        if HW % t == 0:
            best = t
    # v7x megacore: keep >= 2 parallel grid steps when a single block would cover the
    # whole input (no effect on v5e/v6e's single TensorCore).
    if B * (HW // best) < 2 and best % 256 == 0:
        best //= 2
    return best


def sliding_slicer(x, slice_size=SLICE_SIZE):
    """x: (B, D, H, W) -> (B, D, slice_size, H, W), matching SlidingSlicer.forward.
    Pure and jittable: no host sync, no per-call fallback."""
    assert slice_size == SLICE_SIZE
    B, D, H, W = (int(s) for s in x.shape)
    HW = H * W
    hwt = _choose_hw_tile(B, D, HW, x.dtype.itemsize)
    n_hw = HW // hwt
    xr = x.reshape(B, D, HW)

    cost = pl.CostEstimate(flops=0, transcendentals=0,
                           bytes_accessed=(1 + SLICE_SIZE) * xr.size * x.dtype.itemsize)
    out = pl.pallas_call(
        _slicer_kernel_dense,
        out_shape=jax.ShapeDtypeStruct((B, D * SLICE_SIZE, HW), x.dtype),
        grid=(B, n_hw),
        in_specs=[pl.BlockSpec((1, D, hwt), lambda b, j: (b, 0, j))],
        out_specs=pl.BlockSpec((1, D * SLICE_SIZE, hwt), lambda b, j: (b, 0, j)),
        compiler_params=pltpu.CompilerParams(
            dimension_semantics=("parallel", "parallel"),
            vmem_limit_bytes=int(min(_VMEM_CAP // 2, 64 * _MiB))),
        cost_estimate=cost,
    )(xr)
    return out.reshape(B, D, SLICE_SIZE, H, W)           # free reshape (row-major interleave)


def ref_sliding_slicer(x, slice_size=SLICE_SIZE):
    """Pure-JAX reference of the PyTorch SlidingSlicer module."""
    B, D, H, W = x.shape
    pad = slice_size // 2
    xp = jnp.pad(x, ((0, 0), (pad, pad), (0, 0), (0, 0)))
    outs = [xp[:, i:i + D] for i in range(slice_size)]
    return jnp.stack(outs, axis=2)                       # (B, D, S, H, W)


# ----------------------------------------------------------------------------------------
if __name__ == "__main__":
    key = jax.random.PRNGKey(0)
    k1, k2, k3, k4, k5, k6 = jax.random.split(key, 6)

    # --- AxialClsModel3 head: flatten -> permute -> AttentionPooling -> Dropout -> Linear(6)
    # TODO(synk): ResNet3dCSN backbone itself is not translated; features stand in for it.
    B, C, T, H, W = 2, 64, 2, 8, 16                      # N = T*H*W = 256 (lane aligned)
    feats = jax.random.normal(k1, (B, C, T, H, W), dtype=jnp.float32).astype(jnp.bfloat16)
    attn_w = jax.random.normal(k2, (1, C), jnp.float32) / (C ** 0.5)   # PyTorch (1, C) layout
    attn_b = jax.random.normal(k3, (1,), jnp.float32) * 0.1
    fc_w = jax.random.normal(k4, (6, C), jnp.float32) / (C ** 0.5)     # PyTorch (K, C) layout
    fc_b = jax.random.normal(k5, (6,), jnp.float32) * 0.1

    logits = jax.block_until_ready(attention_pool_fc(feats, attn_w, attn_b, fc_w, fc_b))
    # Also exercise the online-softmax multi-tile + batched-block path explicitly.
    logits_tiled = jax.block_until_ready(
        attention_pool_fc(feats, attn_w, attn_b, fc_w, fc_b, lane_tile=128, batch_tile=2))
    logits_ref = ref_attention_pool_fc(feats, attn_w, attn_b, fc_w, fc_b)
    assert logits.shape == (B, 6)
    assert jnp.allclose(logits, logits_ref, atol=1e-2, rtol=1e-2), "head mismatch vs reference"
    assert jnp.allclose(logits_tiled, logits_ref, atol=1e-2, rtol=1e-2), "tiled head mismatch"

    # --- SlidingSlicer kernel (previously reviewed), with store-pattern feedback applied ---
    Bs, Ds, Hs, Ws = 2, 8, 8, 16                         # H*W = 128
    x = jax.random.normal(k6, (Bs, Ds, Hs, Ws), dtype=jnp.float32)
    out = jax.block_until_ready(sliding_slicer(x))
    ref = ref_sliding_slicer(x)
    assert out.shape == (Bs, Ds, SLICE_SIZE, Hs, Ws)
    assert jnp.allclose(out, ref, atol=1e-6), "slicer mismatch vs reference"

    print("KERNEL_OK")
</pallas_src>

<mosaic_0001>
module attributes {stable_mosaic.version = 11 : i64} {
  func.func @_attn_head_kernel(%arg0: i32, %arg1: i32, %arg2: memref<1x64x256xbf16, #tpu.memory_space<vmem>>, %arg3: memref<64x1xf32, #tpu.memory_space<vmem>>, %arg4: memref<1x1xf32, #tpu.memory_space<vmem>>, %arg5: memref<64x6xf32, #tpu.memory_space<vmem>>, %arg6: memref<1x6xf32, #tpu.memory_space<vmem>>, %arg7: memref<1x1x6xf32, #tpu.memory_space<vmem>>, %arg8: memref<1x1x1xf32, #tpu.memory_space<vmem>>, %arg9: memref<1x1x1xf32, #tpu.memory_space<vmem>>, %arg10: memref<1x64x1xf32, #tpu.memory_space<vmem>>) attributes {dimension_semantics = [#tpu.dimension_semantics<parallel>, #tpu.dimension_semantics<arbitrary>], iteration_bounds = array<i64: 2, 1>, scalar_prefetch = 0 : i64, scratch_operands = 3 : i64, tpu.core_type = #tpu.core_type<tc>, window_params = [{transform_indices = @transform_0, window_bounds = array<i64: 1, 64, 256>}, {pipeline_mode = #tpu.pipeline_mode<synchronous>, transform_indices = @transform_1, window_bounds = array<i64: 64, 1>}, {pipeline_mode = #tpu.pipeline_mode<synchronous>, transform_indices = @transform_2, window_bounds = array<i64: 1, 1>}, {pipeline_mode = #tpu.pipeline_mode<synchronous>, transform_indices = @transform_3, window_bounds = array<i64: 64, 6>}, {pipeline_mode = #tpu.pipeline_mode<synchronous>, transform_indices = @transform_4, window_bounds = array<i64: 1, 6>}, {transform_indices = @transform_5, window_bounds = array<i64: 1, 1, 6>}]} {
    %c0_i32 = arith.constant 0 : i32
    %0 = arith.cmpi eq, %arg1, %c0_i32 : i32
    %1 = arith.extui %0 : i1 to i32
    %c0_i32_0 = arith.constant 0 : i32
    %2 = arith.cmpi ne, %1, %c0_i32_0 : i32
    scf.if %2 {
      %cst_30 = arith.constant 0xFF800000 : f32
      %43 = vector.broadcast %cst_30 : f32 to vector<1x1x1xf32>
      %c0_31 = arith.constant 0 : index
      %c0_32 = arith.constant 0 : index
      %c0_33 = arith.constant 0 : index
      %44 = vector.load %arg8[%c0_31, %c0_32, %c0_33] : memref<1x1x1xf32, #tpu.memory_space<vmem>>, vector<1x1x1xf32>
      tpu.vector_store %arg8[%c0_31, %c0_32, %c0_33], %43 {strides = array<i32>} : memref<1x1x1xf32, #tpu.memory_space<vmem>>, vector<1x1x1xf32>,
      %cst_34 = arith.constant 0.000000e+00 : f32
      %45 = vector.broadcast %cst_34 : f32 to vector<1x1x1xf32>
      %c0_35 = arith.constant 0 : index
      %c0_36 = arith.constant 0 : index
      %c0_37 = arith.constant 0 : index
      %46 = vector.load %arg9[%c0_35, %c0_36, %c0_37] : memref<1x1x1xf32, #tpu.memory_space<vmem>>, vector<1x1x1xf32>
      tpu.vector_store %arg9[%c0_35, %c0_36, %c0_37], %45 {strides = array<i32>} : memref<1x1x1xf32, #tpu.memory_space<vmem>>, vector<1x1x1xf32>,
      %cst_38 = arith.constant 0.000000e+00 : f32
      %47 = vector.broadcast %cst_38 : f32 to vector<1x64x1xf32>
      %c0_39 = arith.constant 0 : index
      %c0_40 = arith.constant 0 : index
      %c0_41 = arith.constant 0 : index
      %48 = vector.load %arg10[%c0_39, %c0_40, %c0_41] : memref<1x64x1xf32, #tpu.memory_space<vmem>>, vector<1x64x1xf32>
      tpu.vector_store %arg10[%c0_39, %c0_40, %c0_41], %47 {strides = array<i32>} : memref<1x64x1xf32, #tpu.memory_space<vmem>>, vector<1x64x1xf32>,
    } else {
    }
    %c0 = arith.constant 0 : index
    %c0_1 = arith.constant 0 : index
    %c0_2 = arith.constant 0 : index
    %3 = vector.load %arg2[%c0, %c0_1, %c0_2] : memref<1x64x256xbf16, #tpu.memory_space<vmem>>, vector<1x64x256xbf16>
    %4 = arith.extf %3 : vector<1x64x256xbf16> to vector<1x64x256xf32>
    %c0_3 = arith.constant 0 : index
    %c0_4 = arith.constant 0 : index
    %5 = vector.load %arg3[%c0_3, %c0_4] : memref<64x1xf32, #tpu.memory_space<vmem>>, vector<64x1xf32>
    %6 = vector.shape_cast %5 : vector<64x1xf32> to vector<1x64x1xf32>
    %7 = vector.broadcast %6 : vector<1x64x1xf32> to vector<1x64x256xf32>
    %8 = arith.mulf %7, %4 : vector<1x64x256xf32>
    %cst = arith.constant dense<0.000000e+00> : vector<1x256xf32>
    %9 = vector.multi_reduction <add>, %8, %cst [1] : vector<1x64x256xf32> to vector<1x256xf32>
    %10 = vector.shape_cast %9 : vector<1x256xf32> to vector<1x1x256xf32>
    %c0_5 = arith.constant 0 : index
    %c0_6 = arith.constant 0 : index
    %11 = vector.load %arg4[%c0_5, %c0_6] : memref<1x1xf32, #tpu.memory_space<vmem>>, vector<1x1xf32>
    %12 = vector.shape_cast %11 : vector<1x1xf32> to vector<1x1x1xf32>
    %13 = vector.broadcast %12 : vector<1x1x1xf32> to vector<1x1x256xf32>
    %14 = arith.addf %10, %13 : vector<1x1x256xf32>
    %c0_7 = arith.constant 0 : index
    %c0_8 = arith.constant 0 : index
    %c0_9 = arith.constant 0 : index
    %15 = vector.load %arg8[%c0_7, %c0_8, %c0_9] : memref<1x1x1xf32, #tpu.memory_space<vmem>>, vector<1x1x1xf32>
    %cst_10 = arith.constant dense<0xFF800000> : vector<1x1xf32>
    %16 = vector.multi_reduction <maximumf>, %14, %cst_10 [2] : vector<1x1x256xf32> to vector<1x1xf32>
    %17 = vector.shape_cast %16 : vector<1x1xf32> to vector<1x1x1xf32>
    %18 = arith.maximumf %15, %17 : vector<1x1x1xf32>
    %19 = arith.subf %15, %18 : vector<1x1x1xf32>
    %20 = math.exp %19 : vector<1x1x1xf32>
    %21 = vector.broadcast %18 : vector<1x1x1xf32> to vector<1x1x256xf32>
    %22 = arith.subf %14, %21 : vector<1x1x256xf32>
    %23 = math.exp %22 : vector<1x1x256xf32>
    %c0_11 = arith.constant 0 : index
    %c0_12 = arith.constant 0 : index
    %c0_13 = arith.constant 0 : index
    %24 = vector.load %arg9[%c0_11, %c0_12, %c0_13] : memref<1x1x1xf32, #tpu.memory_space<vmem>>, vector<1x1x1xf32>
    %25 = arith.mulf %20, %24 : vector<1x1x1xf32>
    %cst_14 = arith.constant dense<0.000000e+00> : vector<1x1xf32>
    %26 = vector.multi_reduction <add>, %23, %cst_14 [2] : vector<1x1x256xf32> to vector<1x1xf32>
    %27 = vector.shape_cast %26 : vector<1x1xf32> to vector<1x1x1xf32>
    %28 = arith.addf %25, %27 : vector<1x1x1xf32>
    %c0_15 = arith.constant 0 : index
    %c0_16 = arith.constant 0 : index
    %c0_17 = arith.constant 0 : index
    %29 = vector.load %arg9[%c0_15, %c0_16, %c0_17] : memref<1x1x1xf32, #tpu.memory_space<vmem>>, vector<1x1x1xf32>
    tpu.vector_store %arg9[%c0_15, %c0_16, %c0_17], %28 {strides = array<i32>} : memref<1x1x1xf32, #tpu.memory_space<vmem>>, vector<1x1x1xf32>,
    %c0_18 = arith.constant 0 : index
    %c0_19 = arith.constant 0 : index
    %c0_20 = arith.constant 0 : index
    %30 = vector.load %arg10[%c0_18, %c0_19, %c0_20] : memref<1x64x1xf32, #tpu.memory_space<vmem>>, vector<1x64x1xf32>
    %31 = vector.broadcast %20 : vector<1x1x1xf32> to vector<1x64x1xf32>
    %32 = arith.mulf %31, %30 : vector<1x64x1xf32>
    %33 = vector.broadcast %23 : vector<1x1x256xf32> to vector<1x64x256xf32>
    %34 = arith.mulf %4, %33 : vector<1x64x256xf32>
    %cst_21 = arith.constant dense<0.000000e+00> : vector<1x64xf32>
    %35 = vector.multi_reduction <add>, %34, %cst_21 [2] : vector<1x64x256xf32> to vector<1x64xf32>
    %36 = vector.shape_cast %35 : vector<1x64xf32> to vector<1x64x1xf32>
    %37 = arith.addf %32, %36 : vector<1x64x1xf32>
    %c0_22 = arith.constant 0 : index
    %c0_23 = arith.constant 0 : index
    %c0_24 = arith.constant 0 : index
    %38 = vector.load %arg10[%c0_22, %c0_23, %c0_24] : memref<1x64x1xf32, #tpu.memory_space<vmem>>, vector<1x64x1xf32>
    tpu.vector_store %arg10[%c0_22, %c0_23, %c0_24], %37 {strides = array<i32>} : memref<1x64x1xf32, #tpu.memory_space<vmem>>, vector<1x64x1xf32>,
    %c0_25 = arith.constant 0 : index
    %c0_26 = arith.constant 0 : index
    %c0_27 = arith.constant 0 : index
    %39 = vector.load %arg8[%c0_25, %c0_26, %c0_27] : memref<1x1x1xf32, #tpu.memory_space<vmem>>, vector<1x1x1xf32>
    tpu.vector_store %arg8[%c0_25, %c0_26, %c0_27], %18 {strides = array<i32>} : memref<1x1x1xf32, #tpu.memory_space<vmem>>, vector<1x1x1xf32>,
    %c0_i32_28 = arith.constant 0 : i32
    %40 = arith.cmpi eq, %arg1, %c0_i32_28 : i32
    %41 = arith.extui %40 : i1 to i32
    %c0_i32_29 = arith.constant 0 : i32
    %42 = arith.cmpi ne, %41, %c0_i32_29 : i32
    scf.if %42 {
      %c0_30 = arith.constant 0 : index
      %c0_31 = arith.constant 0 : index
      %c0_32 = arith.constant 0 : index
      %43 = vector.load %arg9[%c0_30, %c0_31, %c0_32] : memref<1x1x1xf32, #tpu.memory_space<vmem>>, vector<1x1x1xf32>
      %44 = tpu.reciprocal %43 {approx = true} : vector<1x1x1xf32> -> vector<1x1x1xf32>
      %c0_33 = arith.constant 0 : index
      %c0_34 = arith.constant 0 : index
      %c0_35 = arith.constant 0 : index
      %45 = vector.load %arg10[%c0_33, %c0_34, %c0_35] : memref<1x64x1xf32, #tpu.memory_space<vmem>>, vector<1x64x1xf32>
      %46 = vector.broadcast %44 : vector<1x1x1xf32> to vector<1x64x1xf32>
      %47 = arith.mulf %45, %46 : vector<1x64x1xf32>
      %c0_36 = arith.constant 0 : index
      %c0_37 = arith.constant 0 : index
      %48 = vector.load %arg5[%c0_36, %c0_37] : memref<64x6xf32, #tpu.memory_space<vmem>>, vector<64x6xf32>
      %49 = vector.shape_cast %48 : vector<64x6xf32> to vector<1x64x6xf32>
      %50 = vector.broadcast %47 : vector<1x64x1xf32> to vector<1x64x6xf32>
      %51 = arith.mulf %50, %49 : vector<1x64x6xf32>
      %cst_38 = arith.constant dense<0.000000e+00> : vector<1x6xf32>
      %52 = vector.multi_reduction <add>, %51, %cst_38 [1] : vector<1x64x6xf32> to vector<1x6xf32>
      %53 = vector.shape_cast %52 : vector<1x6xf32> to vector<1x1x6xf32>
      %c0_39 = arith.constant 0 : index
      %c0_40 = arith.constant 0 : index
      %54 = vector.load %arg6[%c0_39, %c0_40] : memref<1x6xf32, #tpu.memory_space<vmem>>, vector<1x6xf32>
      %55 = vector.shape_cast %54 : vector<1x6xf32> to vector<1x1x6xf32>
      %56 = arith.addf %53, %55 : vector<1x1x6xf32>
      %c0_41 = arith.constant 0 : index
      %c0_42 = arith.constant 0 : index
      %c0_43 = arith.constant 0 : index
      %57 = vector.load %arg7[%c0_41, %c0_42, %c0_43] : memref<1x1x6xf32, #tpu.memory_space<vmem>>, vector<1x1x6xf32>
      tpu.vector_store %arg7[%c0_41, %c0_42, %c0_43], %56 {strides = array<i32>} : memref<1x1x6xf32, #tpu.memory_space<vmem>>, vector<1x1x6xf32>,
    } else {
    }
    return
  }
  func.func @transform_0(%arg0: i32, %arg1: i32) -> (i32, i32, i32) {
    %c0_i32 = arith.constant 0 : i32
    %c0_i32_0 = arith.constant 0 : i32
    return %arg0, %c0_i32, %arg1 : i32, i32, i32
  }
  func.func @transform_1(%arg0: i32, %arg1: i32) -> (i32, i32) {
    %c0_i32 = arith.constant 0 : i32
    %c0_i32_0 = arith.constant 0 : i32
    %c0_i32_1 = arith.constant 0 : i32
    return %c0_i32, %c0_i32_0 : i32, i32
  }
  func.func @transform_2(%arg0: i32, %arg1: i32) -> (i32, i32) {
    %c0_i32 = arith.constant 0 : i32
    %c0_i32_0 = arith.constant 0 : i32
    %c0_i32_1 = arith.constant 0 : i32
    return %c0_i32, %c0_i32_0 : i32, i32
  }
  func.func @transform_3(%arg0: i32, %arg1: i32) -> (i32, i32) {
    %c0_i32 = arith.constant 0 : i32
    %c0_i32_0 = arith.constant 0 : i32
    %c0_i32_1 = arith.constant 0 : i32
    return %c0_i32, %c0_i32_0 : i32, i32
  }
  func.func @transform_4(%arg0: i32, %arg1: i32) -> (i32, i32) {
    %c0_i32 = arith.constant 0 : i32
    %c0_i32_0 = arith.constant 0 : i32
    %c0_i32_1 = arith.constant 0 : i32
    return %c0_i32, %c0_i32_0 : i32, i32
  }
  func.func @transform_5(%arg0: i32, %arg1: i32) -> (i32, i32, i32) {
    %c0_i32 = arith.constant 0 : i32
    %c0_i32_0 = arith.constant 0 : i32
    %c0_i32_1 = arith.constant 0 : i32
    return %arg0, %c0_i32, %c0_i32_0 : i32, i32, i32
  }
}

</mosaic_0001>

<bundles_post_ra>
// kernel: tpu_custom_call.1
= control target key start
LH: loop header
LB: loop body
LE: loop exit
PB: predicated region body
PF: predicated region fallthrough
CT: control target
= control target key end

     0   :  { %s1161_s0 = inlined_call_operand.vmem [shape: bf16[2,64,256], index: 0, kind: input, shape index: {}]   ;;  %s1162_s1 = inlined_call_operand.vmem [shape: f32[64,1], index: 1, kind: input, shape index: {}]   ;;  %s1163_s2 = inlined_call_operand.<no memory space> [shape: f32[1,1], index: 2, kind: input, shape index: {}]   ;;  %s1164_s3 = inlined_call_operand.vmem [shape: f32[64,6], index: 3, kind: input, shape index: {}]   ;;  %s1165_s4 = inlined_call_operand.vmem [shape: f32[1,6], index: 4, kind: input, shape index: {}]   ;;  %s1166_s5 = inlined_call_operand.hbm [shape: f32[2,1,6], index: 5, kind: output, shape index: {}]  }
   0x1   :  { %v10_v0 = vstv %s1163_s2 }
   0x2   :  { %11 = vst [vmem:[#allocation5] sm:$0x1] %v10_v0 }
   0x3   :  { %12 = vsyncpa [#allocation7], 0 }
   0x4   :  { %14 = vsyncpa [#allocation7 + $0x1], 0  ;;  %s879_s20 = smov 0   ;;  %s881_s21 = smov 0  }
   0x5   :  { %s883_s22 = smov 0   ;;  %s885_s23 = smov 0  }
   0x6   :  { %s887_s24 = smov 0   ;;  %s889_s25 = smov 0  }
   0x7 LB: > { %s684_s2 = sadd.s32 4294967295, %s841_s25   ;;  %s685_s26 = sadd.s32 4294967294, %s841_s25   ;;  %s841_s25 = sphi %s889_s25, %s20_s25   ;;  %s837_s24 = sphi %s887_s24, %s1173_s24   ;;  %s833_s23 = sphi %s885_s23, %s1172_s23   ;;  %s829_s22 = sphi %s883_s22, %s1171_s22   ;;  %s825_s21 = sphi %s881_s21, %s1170_s21   ;;  %s821_s20 = sphi %s879_s20, %s1169_s20  }
   0x8   : > { %s32_s27 = sadd.s32 1, %s837_s24  ;;  %s151_s28 = sadd.s32 1, %s829_s22 }
   0x9   : > { %p34_p0 = scmp.ge.s32.totalorder %s32_s27, 2  ;;  %p161_p1 = scmp.ne.s32.totalorder %s829_s22, %s825_s21 }
   0xa   : > { %p162_p2 = scmp.eq.s32.totalorder %s684_s2, 1  ;;  %p167_p3 = scmp.ne.s32.totalorder %s825_s21, %s821_s20 }
   0xb   : > { %s1175_s27 = smov (%p34_p0, %s32_s27), 0  ;;  %p168_p5 = scmp.eq.s32.totalorder %s685_s26, 1 }
   0xc   : > { %p919_p4 = por %p162_p2, %p161_p1  ;;  %s148_s30 = ssub.s32 %s837_s24, %s1175_s27 }
   0xd   : > { %p688_p6 = scmp.ge.s32.totalorder %s841_s25, 1  ;;  %p149_p7 = scmp.eq.s32.totalorder %s148_s30, 0 }
   0xe   : > { %p926_p8 = por %p168_p5, %p167_p3  ;;  %p211_p9 = scmp.lt.s32.totalorder %s841_s25, 3 }
   0xf   : > { %s932_s7 = scalar_select %p149_p7, %s829_s22, %s151_s28  }
  0x10   : > { %p212_p10 = pnand %p688_p6, %p211_p9 }
  0x11   : > { %p243_p11 = scmp.lt.s32.totalorder (!%p212_p10), %s833_s23, 1  ;;  %s240_s13 = sand.u32 (!%p212_p10), 1, %s825_s21  }
  0x12   : > { %215 = sbr.rel (%p212_p10) target bundleno = 722 (0x2d2), region = 40  ;;  %s611_s16 = scalar_lea.hbm (!%p212_p10), %s1166_s5, %s833_s23 }
  0x13   : > { %s241_s19 = scalar_lea.vmem (!%p212_p10), [#allocation6], %s240_s13  ;;  %s615_s26 = sshll.u32 (!%p212_p10), %s611_s16, 4  ;;  %s616_s26 = int_to_ptr.hbm [resolvable:$true] %s615_s26 }
  0x14   : > { %s613_s2 = sshll.u32 (!%p212_p10), %s241_s19, 4  ;;  %s603_s28 = scalar_lea.sflag (!%p212_p10), [#allocation7], %s240_s13  ;;  %s614_s2 = int_to_ptr.vmem [resolvable:$true] %s613_s2 }
  0x15   : > { %s777_s30 = sshra.s32 (!%p212_p10), %s616_s26, 4  ;;  %s783_s10 = scalar_lea.hbm (!%p212_p10), %s1166_s5, 2  ;;  %s778_s30 = int_to_ptr.hbm [resolvable:$true] %s777_s30 }
  0x16   : > { %p784_p1 = scmp.lt.s32.totalorder (!%p212_p10), %s778_s30, %s1166_s5 }
  0x17   : > { %v294_v1 = vld [vmem:[%s1162_s1 + $0x10] sm:$0xff]  ;;  %v292_v2 = vld [vmem:[%s1162_s1] sm:$0xff]  ;;  %v843_v3 = vmov 0   ;;  %v295_v5 = vld [vmem:[%s1162_s1 + $0x18] sm:$0xff]  ;;  %s244_s8 = scalar_select %p243_p11, %s833_s23, 1  ;;  %vm256_vm0 = vcmask 0  }
  0x18   : > { %753 = vset.pattern.permute.xlu1 %v843_v3  ;;  %752 = vset.pattern.permute.xlu0 %v843_v3  ;;  %v296_v4 = vld [vmem:[%s1162_s1 + $0x20] sm:$0xff]  ;;  %v293_v6 = vld [vmem:[%s1162_s1 + $0x8] sm:$0xff]  ;;  %v299_v8 = vld [vmem:[%s1162_s1 + $0x38] sm:$0xff]  ;;  %v844_v38 = vmov -inf   ;;  %vm259_vm1 = vcmask 7168   ;;  %vm576_vm2 = vcmask 48128  }
  0x19   : > { %312 = vperm.xlu1 %753, %v294_v1   ;;  %302 = vperm.xlu0 %752, %v292_v2   ;;  %v297_v7 = vld [vmem:[%s1162_s1 + $0x28] sm:$0xff]  ;;  %v298_v9 = vld [vmem:[%s1162_s1 + $0x30] sm:$0xff]  ;;  %v382_v10 = vld [vmem:[#allocation5] sm:$0x1]  ;;  %s693_s9 = sshll.u32 %s244_s8, 6  ;;  %vm600_vm3 = vcmask 40960  }
  0x1a   : > { %754 = vset.pattern.permute.xlu2 %v843_v3  ;;  %s963_s12 = scalar_lea.vmem %s1161_s0, %s693_s9  ;;  %257 = vst.msk [vmem:[#allocation2] sm:$0x1] %vm256_vm0, %v844_v38  ;;  %s779_s8 = scalar_lea.hbm %s778_s30, 1 }
  0x1b   : > { %322 = vperm.xlu2 %754, %v296_v4   ;;  %v966_v13 = vld [vmem:[%s963_s12] sm:$0xff]  ;;  %v969_v14 = vld [vmem:[%s963_s12 + $0x8] sm:$0xff]  ;;  %v972_v15 = vld [vmem:[%s963_s12 + $0x10] sm:$0xff]  ;;  %p780_p12 = scmp.ne.s32.totalorder %s778_s30, %s779_s8  ;;  %p785_p2 = scmp.lt.s32.totalorder %s783_s10, %s779_s8 }
  0x1c   : > { %v276_v16 = vunpack.c.l.bf16 %v966_v13  ;;  %v277_v17 = vunpack.c.h.bf16 %v966_v13  ;;  %v977_v18 = vld [vmem:[%s963_s12 + $0x18] sm:$0xff]  ;;  %v278_v19 = vunpack.c.l.bf16 %v969_v14  ;;  %v279_v20 = vunpack.c.h.bf16 %v969_v14  ;;  %v986_v27 = vld [vmem:[%s963_s12 + $0x20] sm:$0xff]  ;;  %v997_v33 = vld [vmem:[%s963_s12 + $0x28] sm:$0xff] }
  0x1d   : > { %v280_v22 = vunpack.c.l.bf16 %v972_v15  ;;  %v281_v23 = vunpack.c.h.bf16 %v972_v15  ;;  %v282_v24 = vunpack.c.l.bf16 %v977_v18  ;;  %v283_v25 = vunpack.c.h.bf16 %v977_v18  ;;  %v1011_v45 = vld [vmem:[%s963_s12 + $0x30] sm:$0xff]  ;;  %v1016_v48 = vld [vmem:[%s963_s12 + $0x38] sm:$0xff]  ;;  %p781_p13 = pnand %p780_p12, %p919_p4  ;;  %p786_p3 = por %p785_p2, %p784_p1 }
  0x1e   : > { %v284_v39 = vunpack.c.l.bf16 %v986_v27  ;;  %v285_v40 = vunpack.c.h.bf16 %v986_v27  ;;  %v286_v46 = vunpack.c.l.bf16 %v997_v33  ;;  %v287_v47 = vunpack.c.h.bf16 %v997_v33 }
  0x1f   : > { %v288_v53 = vunpack.c.l.bf16 %v1011_v45  ;;  %v289_v54 = vunpack.c.h.bf16 %v1011_v45  ;;  %v290_v56 = vunpack.c.l.bf16 %v1016_v48  ;;  %v291_v57 = vunpack.c.h.bf16 %v1016_v48  ;;  %p782_p0 = pneg %p781_p13 }
  0x21   : > { %317 = vperm.xlu1 %753, %v295_v5   ;;  %307 = vperm.xlu0 %752, %v293_v6   ;;  %p787_p5 = pnand %p786_p3, %p782_p0 }
  0x23   : > { %327 = vperm.xlu2 %754, %v297_v7  }
  0x29   : > { %337 = vperm.xlu1 %753, %v299_v8   ;;  %332 = vperm.xlu0 %752, %v298_v9  }
  0x2b   : > { %385 = vperm.xlu2 %754, %v382_v10  }
  0x75   : > { %v323_v21 = vpop.permute.xlu2 %322 }
  0x76   : > { %v348_v51 = vmul.f32 %v323_v21, %v284_v39  ;;  %v349_v52 = vmul.f32 %v323_v21, %v285_v40 }
  0x7d   : > { %v328_v55 = vpop.permute.xlu2 %327 }
  0x7e   : > { %v350_v59 = vmul.f32 %v328_v55, %v286_v46  ;;  %v351_v60 = vmul.f32 %v328_v55, %v287_v47 }
  0x8b   : > { %v313_v11 = vpop.permute.xlu1 %312  ;;  %v303_v12 = vpop.permute.xlu0 %302 }
  0x8c   : > { %v340_v28 = vmul.f32 %v303_v12, %v276_v16  ;;  %v341_v29 = vmul.f32 %v303_v12, %v277_v17  ;;  %v344_v34 = vmul.f32 %v313_v11, %v280_v22  ;;  %v345_v35 = vmul.f32 %v313_v11, %v281_v23 }
  0x93   : > { %v308_v26 = vpop.permute.xlu0 %307  ;;  %v318_v30 = vpop.permute.xlu1 %317 }
  0x94   : > { %v342_v31 = vmul.f32 %v308_v26, %v278_v19  ;;  %v343_v32 = vmul.f32 %v308_v26, %v279_v20  ;;  %v346_v41 = vmul.f32 %v318_v30, %v282_v24  ;;  %v347_v42 = vmul.f32 %v318_v30, %v283_v25 }
  0x96   : > { %v356_v36 = vadd.f32 %v342_v31, %v340_v28  ;;  %v369_v37 = vadd.f32 %v343_v32, %v341_v29  ;;  %v386_v31 = vpop.permute.xlu2 %385 }
  0x98   : > { %v357_v43 = vadd.f32 %v356_v36, %v344_v34  ;;  %v370_v44 = vadd.f32 %v369_v37, %v345_v35  ;;  %v388_v35 = vperm.slane %v386_v31, 0 }
  0x9a   : > { %v358_v49 = vadd.f32 %v357_v43, %v346_v41  ;;  %v371_v50 = vadd.f32 %v370_v44, %v347_v42  ;;  %v845_v43 = vmov 0.0   ;;  %v391_v44 = vld [vmem:[#allocation2] sm:$0x1] }
  0x9b   : > { %v333_v58 = vpop.permute.xlu0 %332  ;;  %v338_v63 = vpop.permute.xlu1 %337  ;;  %258 = vst.msk [vmem:[#allocation3] sm:$0x1] %vm256_vm0, %v845_v43 }
  0x9c   : > { %v359_v61 = vadd.f32 %v358_v49, %v348_v51  ;;  %v372_v62 = vadd.f32 %v371_v50, %v349_v52  ;;  %v352_v0 = vmul.f32 %v333_v58, %v288_v53  ;;  %v353_v1 = vmul.f32 %v333_v58, %v289_v54  ;;  %262 = vst.msk [vmem:[#allocation4 + $0x10] sm:$0xff] %vm259_vm1, %v845_v43 }
  0x9d   : > { %v354_v4 = vmul.f32 %v338_v63, %v290_v56  ;;  %v355_v5 = vmul.f32 %v338_v63, %v291_v57  ;;  %260 = vst.msk [vmem:[#allocation4] sm:$0xff] %vm259_vm1, %v845_v43 }
  0x9e   : > { %v360_v2 = vadd.f32 %v359_v61, %v350_v59  ;;  %v373_v3 = vadd.f32 %v372_v62, %v351_v60  ;;  %261 = vst.msk [vmem:[#allocation4 + $0x8] sm:$0xff] %vm259_vm1, %v845_v43 }
  0x9f   : > { %263 = vst.msk [vmem:[#allocation4 + $0x18] sm:$0xff] %vm259_vm1, %v845_v43 }
  0xa0   : > { %v361_v6 = vadd.f32 %v360_v2, %v352_v0  ;;  %v374_v7 = vadd.f32 %v373_v3, %v353_v1  ;;  %264 = vst.msk [vmem:[#allocation4 + $0x20] sm:$0xff] %vm259_vm1, %v845_v43 }
  0xa1   : > { %265 = vst.msk [vmem:[#allocation4 + $0x28] sm:$0xff] %vm259_vm1, %v845_v43 }
  0xa2   : > { %v362_v8 = vadd.f32 %v361_v6, %v354_v4  ;;  %v375_v9 = vadd.f32 %v374_v7, %v355_v5  ;;  %266 = vst.msk [vmem:[#allocation4 + $0x30] sm:$0xff] %vm259_vm1, %v845_v43 }
  0xa3   : > { %267 = vst.msk [vmem:[#allocation4 + $0x38] sm:$0xff] %vm259_vm1, %v845_v43 }
  0xa4   : > { %v363_v10 = vrot.slane %v362_v8, 4  ;;  %v376_v11 = vrot.slane %v375_v9, 4  ;;  %v419_v48 = vld [vmem:[#allocation4] sm:$0xff] }
  0xa6   : > { %v364_v12 = vadd.f32 %v363_v10, %v362_v8  ;;  %v377_v21 = vadd.f32 %v376_v11, %v375_v9  ;;  %v421_v10 = vld [vmem:[#allocation4 + $0x10] sm:$0xff] }
  0xa8   : > { %v365_v26 = vrot.slane %v364_v12, 2  ;;  %v378_v28 = vrot.slane %v377_v21, 2  ;;  %v424_v31 = vld [vmem:[#allocation4 + $0x28] sm:$0xff] }
  0xaa   : > { %v366_v29 = vadd.f32 %v365_v26, %v364_v12  ;;  %v379_v30 = vadd.f32 %v378_v28, %v377_v21 }
  0xac   : > { %v367_v32 = vrot.slane %v366_v29, 1  ;;  %v380_v34 = vrot.slane %v379_v30, 1 }
  0xae   : > { %v368_v36 = vadd.f32 %v367_v32, %v366_v29  ;;  %v381_v37 = vadd.f32 %v380_v34, %v379_v30  ;;  %v423_v30 = vld [vmem:[#allocation4 + $0x20] sm:$0xff] }
  0xb0   : > { %v389_v38 = vadd.f32 %v388_v35, %v368_v36  ;;  %v390_v41 = vadd.f32 %v388_v35, %v381_v37 }
  0xb2   : > { %v392_v42 = vmax.f32 %v389_v38, %v390_v41 }
  0xb4   : > { %393 = vmax.xlane.f32.xlu0 %v392_v42 }
 0x127   : > { %v394_v49 = vpop.xlane.xlu0 %393 }
 0x128   : > { %v395_v50 = vmax.f32 %v391_v44, %v394_v49  ;;  %v422_v49 = vld [vmem:[#allocation4 + $0x18] sm:$0xff] }
 0x12a   : > { %v396_v51 = vsub.f32 %v391_v44, %v395_v50  ;;  %495 = vst.msk [vmem:[#allocation2] sm:$0x1] %vm256_vm0, %v395_v50  ;;  %401 = vperm.xlu1 %753, %v395_v50   ;;  %v426_v50 = vld [vmem:[#allocation4 + $0x38] sm:$0xff] }
 0x12c   : > { %v397_v18 = vmul.f32 1.442695, %v396_v51 }
 0x19c   : > { %v402_v52 = vpop.permute.xlu1 %401 }
 0x19d   : > { %v404_v55 = vperm.slane %v402_v52, 0 }
 0x19f   : > { %v405_v58 = vsub.f32 %v389_v38, %v404_v55  ;;  %v406_v59 = vsub.f32 %v390_v41, %v404_v55 }
 0x1a1   : > { %v407_v60 = vmul.f32 1.442695, %v405_v58  ;;  %v409_v61 = vmul.f32 1.442695, %v406_v59 }
 0x1a3   : > { %755 = vpow2.f32 %v407_v60 }
 0x1a4   : > { %757 = vpow2.f32 %v409_v61 }
 0x1a5   : > { %759 = vpow2.f32 %v397_v18 }
 0x1a9   : > { %v756_v62 = vpop.eup %755 }
 0x1aa   : > { %v758_v63 = vpop.eup %757  ;;  %v442_v0 = vmul.f32 %v756_v62, %v280_v22  ;;  %v438_v1 = vmul.f32 %v756_v62, %v276_v16  ;;  %v440_v7 = vmul.f32 %v756_v62, %v278_v19  ;;  %v446_v16 = vmul.f32 %v756_v62, %v284_v39 }
 0x1ab   : > { %v413_v2 = vadd.f32 %v758_v63, %v756_v62  ;;  %v443_v3 = vmul.f32 %v758_v63, %v281_v23  ;;  %v439_v4 = vmul.f32 %v758_v63, %v277_v17  ;;  %v441_v22 = vmul.f32 %v758_v63, %v279_v20 }
 0x1ac   : > { %v447_v15 = vmul.f32 %v758_v63, %v285_v40  ;;  %v448_v13 = vmul.f32 %v756_v62, %v286_v46  ;;  %v449_v17 = vmul.f32 %v758_v63, %v287_v47  ;;  %v444_v14 = vmul.f32 %v756_v62, %v282_v24  ;;  %v411_v47 = vld [vmem:[#allocation3] sm:$0x1] }
 0x1ad   : > { %414 = vadd.xlane.f32.xlu2 %v413_v2  ;;  %v460_v5 = vadd.f32 %v443_v3, %v442_v0  ;;  %v454_v6 = vadd.f32 %v439_v4, %v438_v1  ;;  %v457_v23 = vadd.f32 %v441_v22, %v440_v7  ;;  %v445_v19 = vmul.f32 %v758_v63, %v283_v25  ;;  %v760_v25 = vpop.eup %759 }
 0x1ae   : > { %v466_v8 = vadd.f32 %v447_v15, %v446_v16  ;;  %v469_v9 = vadd.f32 %v449_v17, %v448_v13  ;;  %v452_v20 = vmul.f32 %v756_v62, %v290_v56  ;;  %v453_v27 = vmul.f32 %v758_v63, %v291_v57 }
 0x1af   : > { %461 = vadd.xlane.f32.xlu0 %v460_v5  ;;  %455 = vadd.xlane.f32.xlu1 %v454_v6  ;;  %v463_v33 = vadd.f32 %v445_v19, %v444_v14  ;;  %v450_v40 = vmul.f32 %v756_v62, %v288_v53  ;;  %v451_v46 = vmul.f32 %v758_v63, %v289_v54  ;;  %v428_v56 = vperm.slane %v760_v25, 0  ;;  %v420_v54 = vld [vmem:[#allocation4 + $0x8] sm:$0xff]  ;;  %v425_v5 = vld [vmem:[#allocation4 + $0x30] sm:$0xff] }
 0x1b0   : > { %v475_v39 = vadd.f32 %v453_v27, %v452_v20  ;;  %v412_v57 = vmul.f32 %v760_v25, %v411_v47  ;;  %v521_v27 = vld [vmem:[%s1164_s3 + $0x8] sm:$0xff]  ;;  %v522_v25 = vld [vmem:[%s1164_s3 + $0x10] sm:$0xff] }
 0x1b1   : > { %v472_v24 = vadd.f32 %v451_v46, %v450_v40  ;;  %v432_v21 = vmul.f32 %v428_v56, %v421_v10  ;;  %v430_v26 = vmul.f32 %v428_v56, %v419_v48  ;;  %v431_v32 = vmul.f32 %v428_v56, %v420_v54 }
 0x1b2   : > { %v434_v36 = vmul.f32 %v428_v56, %v423_v30  ;;  %v435_v37 = vmul.f32 %v428_v56, %v424_v31  ;;  %v433_v51 = vmul.f32 %v428_v56, %v422_v49  ;;  %v437_v59 = vmul.f32 %v428_v56, %v426_v50 }
 0x1b3   : > { %v436_v6 = vmul.f32 %v428_v56, %v425_v5 }
 0x1b5   : > { %458 = vadd.xlane.f32.xlu2 %v457_v23 }
 0x1b7   : > { %467 = vadd.xlane.f32.xlu0 %v466_v8  ;;  %470 = vadd.xlane.f32.xlu1 %v469_v9 }
 0x1bd   : > { %464 = vadd.xlane.f32.xlu2 %v463_v33 }
 0x1bf   : > { %476 = vadd.xlane.f32.xlu0 %v475_v39  ;;  %v520_v39 = vld [vmem:[%s1164_s3] sm:$0xff] }
 0x1c5   : > { %473 = vadd.xlane.f32.xlu2 %v472_v24 }
 0x220   : > { %v415_v11 = vpop.xlane.xlu2 %414 }
 0x221   : > { %v416_v12 = vadd.f32 %v415_v11, %v412_v57  ;;  %v524_v57 = vld [vmem:[%s1164_s3 + $0x20] sm:$0xff]  ;;  %v523_v11 = vld [vmem:[%s1164_s3 + $0x18] sm:$0xff] }
 0x222   : > { %v462_v28 = vpop.xlane.xlu0 %461  ;;  %v456_v29 = vpop.xlane.xlu1 %455 }
 0x223   : > { %418 = vst.msk [vmem:[#allocation3] sm:$0x1] %vm256_vm0, %v416_v12  ;;  %v480_v45 = vadd.f32 %v462_v28, %v432_v21  ;;  %v478_v53 = vadd.f32 %v456_v29, %v430_v26 }
 0x225   : > { %489 = vst.msk [vmem:[#allocation4 + $0x10] sm:$0xff] %vm259_vm1, %v480_v45  ;;  %v525_v45 = vld [vmem:[%s1164_s3 + $0x28] sm:$0xff] }
 0x226   : > { %487 = vst.msk [vmem:[#allocation4] sm:$0xff] %vm259_vm1, %v478_v53 }
 0x228   : > { %v459_v34 = vpop.xlane.xlu2 %458 }
 0x229   : > { %v479_v35 = vadd.f32 %v459_v34, %v431_v32 }
 0x22a   : > { %v468_v38 = vpop.xlane.xlu0 %467  ;;  %v471_v41 = vpop.xlane.xlu1 %470  ;;  %v499_v42 = vld [vmem:[#allocation3] sm:$0x1] }
 0x22b   : > { %488 = vst.msk [vmem:[#allocation4 + $0x8] sm:$0xff] %vm259_vm1, %v479_v35  ;;  %v482_v43 = vadd.f32 %v468_v38, %v434_v36  ;;  %v483_v44 = vadd.f32 %v471_v41, %v435_v37  ;;  %761 = vrcp.f32 %v499_v42  ;;  %v527_v36 = vld [vmem:[%s1164_s3 + $0x38] sm:$0xff]  ;;  %v526_v37 = vld [vmem:[%s1164_s3 + $0x30] sm:$0xff] }
 0x22c   : > { %v503_v0 = vld [vmem:[#allocation4 + $0x10] sm:$0xff] }
 0x22d   : > { %491 = vst.msk [vmem:[#allocation4 + $0x20] sm:$0xff] %vm259_vm1, %v482_v43  ;;  %v501_v1 = vld [vmem:[#allocation4] sm:$0xff] }
 0x22e   : > { %492 = vst.msk [vmem:[#allocation4 + $0x28] sm:$0xff] %vm259_vm1, %v483_v44 }
 0x230   : > { %v465_v52 = vpop.xlane.xlu2 %464 }
 0x231   : > { %v762_v55 = vpop.eup %761  ;;  %v481_v58 = vadd.f32 %v465_v52, %v433_v51 }
 0x232   : > { %v477_v60 = vpop.xlane.xlu0 %476  ;;  %v510_v61 = vperm.slane %v762_v55, 0  ;;  %v502_v62 = vld [vmem:[#allocation4 + $0x8] sm:$0xff] }
 0x233   : > { %490 = vst.msk [vmem:[#allocation4 + $0x18] sm:$0xff] %vm259_vm1, %v481_v58  ;;  %v485_v63 = vadd.f32 %v477_v60, %v437_v59 }
 0x234   : > { %v514_v2 = vmul.f32 %v510_v61, %v503_v0  ;;  %v513_v3 = vmul.f32 %v510_v61, %v502_v62  ;;  %v512_v4 = vmul.f32 %v510_v61, %v501_v1  ;;  %v505_v16 = vld [vmem:[#allocation4 + $0x20] sm:$0xff] }
 0x235   : > { %494 = vst.msk [vmem:[#allocation4 + $0x38] sm:$0xff] %vm259_vm1, %v485_v63  ;;  %v506_v15 = vld [vmem:[#allocation4 + $0x28] sm:$0xff]  ;;  %v516_v23 = vmul.f32 %v510_v61, %v505_v16  ;;  %v598_v63 = vld [vmem:[%s1165_s4] sm:$0x1] }
 0x236   : > { %540 = vperm.xlu0 %752, %v514_v2   ;;  %535 = vperm.xlu2 %754, %v513_v3   ;;  %v517_v8 = vmul.f32 %v510_v61, %v506_v15 }
 0x237   : > { %530 = vperm.xlu1 %753, %v512_v4  }
 0x238   : > { %v474_v7 = vpop.xlane.xlu2 %473 }
 0x239   : > { %v484_v22 = vadd.f32 %v474_v7, %v436_v6 }
 0x23a   : > { %v504_v13 = vld [vmem:[#allocation4 + $0x18] sm:$0xff] }
 0x23b   : > { %493 = vst.msk [vmem:[#allocation4 + $0x30] sm:$0xff] %vm259_vm1, %v484_v22  ;;  %v515_v17 = vmul.f32 %v510_v61, %v504_v13 }
 0x23c   : > { %v508_v9 = vld [vmem:[#allocation4 + $0x38] sm:$0xff] }
 0x23d   : > { %v519_v20 = vmul.f32 %v510_v61, %v508_v9 }
 0x23e   : > { %550 = vperm.xlu0 %752, %v516_v23   ;;  %555 = vperm.xlu2 %754, %v517_v8  }
 0x23f   : > { %545 = vperm.xlu1 %753, %v515_v17  }
 0x242   : > { %v507_v14 = vld [vmem:[#allocation4 + $0x30] sm:$0xff] }
 0x243   : > { %v518_v19 = vmul.f32 %v510_v61, %v507_v14 }
 0x246   : > { %565 = vperm.xlu0 %752, %v519_v20  }
 0x247   : > { %560 = vperm.xlu1 %753, %v518_v19  }
 0x290   : > { %v536_v33 = vpop.permute.xlu2 %535 }
 0x291   : > { %v569_v24 = vmul.f32 %v536_v33, %v521_v27 }
 0x293   : > { %v578_v56 = vsel %vm576_vm2, %v569_v24, 0.0 }
 0x298   : > { %v556_v53 = vpop.permute.xlu2 %555 }
 0x299   : > { %v573_v32 = vmul.f32 %v556_v53, %v525_v45 }
 0x29b   : > { %v586_v42 = vsel %vm576_vm2, %v573_v32, 0.0 }
 0x2a8   : > { %v541_v40 = vpop.permute.xlu0 %540 }
 0x2a9   : > { %v531_v46 = vpop.permute.xlu1 %530  ;;  %v570_v10 = vmul.f32 %v541_v40, %v522_v25 }
 0x2aa   : > { %v568_v18 = vmul.f32 %v531_v46, %v520_v39 }
 0x2ab   : > { %v580_v26 = vsel %vm576_vm2, %v570_v10, 0.0 }
 0x2ac   : > { %v577_v47 = vsel %vm576_vm2, %v568_v18, 0.0 }
 0x2ad   : > { %v579_v48 = vadd.f32 %v578_v56, %v577_v47 }
 0x2af   : > { %v581_v54 = vadd.f32 %v580_v26, %v579_v48 }
 0x2b0   : > { %v551_v12 = vpop.permute.xlu0 %550 }
 0x2b1   : > { %v546_v21 = vpop.permute.xlu1 %545  ;;  %v572_v28 = vmul.f32 %v551_v12, %v524_v57 }
 0x2b2   : > { %v571_v29 = vmul.f32 %v546_v21, %v523_v11 }
 0x2b3   : > { %v584_v34 = vsel %vm576_vm2, %v572_v28, 0.0 }
 0x2b4   : > { %v582_v30 = vsel %vm576_vm2, %v571_v29, 0.0 }
 0x2b5   : > { %v583_v31 = vadd.f32 %v582_v30, %v581_v54 }
 0x2b7   : > { %v585_v35 = vadd.f32 %v584_v34, %v583_v31 }
 0x2b8   : > { %v566_v38 = vpop.permute.xlu0 %565 }
 0x2b9   : > { %v561_v41 = vpop.permute.xlu1 %560  ;;  %v575_v43 = vmul.f32 %v566_v38, %v527_v36  ;;  %v587_v49 = vadd.f32 %v586_v42, %v585_v35 }
 0x2ba   : > { %v574_v44 = vmul.f32 %v561_v41, %v526_v37 }
 0x2bb   : > { %v590_v52 = vsel %vm576_vm2, %v575_v43, 0.0 }
 0x2bc   : > { %v588_v50 = vsel %vm576_vm2, %v574_v44, 0.0 }
 0x2bd   : > { %v589_v51 = vadd.f32 %v588_v50, %v587_v49 }
 0x2bf   : > { %v591_v55 = vadd.f32 %v590_v52, %v589_v51 }
 0x2c1   : > { %v592_v58 = vrot.slane %v591_v55, 4 }
 0x2c3   : > { %v593_v59 = vadd.f32 %v592_v58, %v591_v55 }
 0x2c5   : > { %v594_v60 = vrot.slane %v593_v59, 2 }
 0x2c7   : > { %v595_v61 = vadd.f32 %v594_v60, %v593_v59 }
 0x2c9   : > { %v596_v62 = vrot.slane %v595_v61, 1 }
 0x2cb   : > { %v597_v0 = vadd.f32 %v596_v62, %v595_v61 }
 0x2cd   : > { %v599_v1 = vadd.f32 %v598_v63, %v597_v0 }
 0x2cf   : > { %601 = vst.msk [vmem:[%s241_s19] sm:$0x1] %vm600_vm3, %v599_v1 }
 0x2d0   : > { %790 = shalt.err (!%p787_p5)
}
 0x2d1   : > { %694 = dma.vmem_to_hbm [thread:$0]  (%p919_p4), %s614_s2, 16, %s616_s26, %s603_s28  }
 0x2d2 PF: > { %p700_p6 = scmp.ge.s32.totalorder %s841_s25, 2  ;;  %s627_s13 = sand.u32 1, %s821_s20  }
 0x2d3   : > { %s628_s14 = scalar_lea.sflag [#allocation7], %s627_s13 }
 0x2d4   : > { %p697_p7 = pnand %p700_p6, %p926_p8 }
 0x2d6   : > { %p698_p9 = pneg %p697_p7 }
 0x2d8   : > { %816 = dma.done.wait (%p698_p9), %s628_s14, 16  }
 0x2d9   : > { %818 = vsyncadd (%p698_p9), %s628_s14, 4294967280  ;;  %s20_s25 = sadd.s32 1, %s841_s25   ;;  %s1169_s20 = smov %s825_s21 }
 0x2da   : > { %p17_p10 = scmp.ge.s32.totalorder %s20_s25, 4   ;;  %s1170_s21 = smov %s829_s22 }
 0x2db   : > { %s1171_s22 = smov %s932_s7  ;;  %s1172_s23 = smov %s837_s24 }
 0x2dc   : > { %s1173_s24 = smov %s1175_s27  ;;  %19 = sbr.rel (!%p17_p10) target bundleno = 7 (0x7), region = 83 }
 0x2e1   :  { %633 = vsyncpa [#allocation7], 1 }
 0x2e2   :  { %635 = vsyncpa [#allocation7 + $0x1], 1 }

</bundles_post_ra>
